<compile_context>
chip_gen: v7x
topology: tpu7x:2x2x1
jax: 0.10.0
libtpu: 0.0.40
codegen_flags: <defaults>
</compile_context>

<pallas_src>
import functools

import jax
import jax.numpy as jnp
from jax.experimental import pallas as pl
from jax.experimental.pallas import tpu as pltpu


def _round_up(x, m):
    return (x + m - 1) // m * m


_VMEM_LIMIT = 48 * 1024 * 1024  # explicit scoped-VMEM budget, safe on v5e/v6e/v7x


def _pick_tile_m(Mp, tmax):
    """Largest row-tile <= tmax that divides Mp (Mp is a multiple of 16; result is too)."""
    t = min(tmax, Mp)
    while t > 16 and Mp % t:
        t //= 2
    if Mp % t:
        t = 16
    return t


# ---------------------------------------------------------------------------
# Pallas kernels
# ---------------------------------------------------------------------------
def _mm_kernel(a_ref, b_ref, s_ref, t_ref, o_ref, *, relu):
    # bf16 x bf16 -> f32 on the MXU, fused per-channel scale/shift (+ ReLU).
    acc = jnp.dot(a_ref[...], b_ref[...], preferred_element_type=jnp.float32)
    y = acc * s_ref[...] + t_ref[...]
    if relu:
        y = jnp.maximum(y, 0.0)
    o_ref[...] = y.astype(o_ref.dtype)


def _mm_res_kernel(a_ref, b_ref, s_ref, t_ref, r_ref, o_ref):
    # Conv3 of the bottleneck: fused BN scale/shift + residual add + ReLU epilogue.
    acc = jnp.dot(a_ref[...], b_ref[...], preferred_element_type=jnp.float32)
    y = acc * s_ref[...] + t_ref[...] + r_ref[...].astype(jnp.float32)
    o_ref[...] = jnp.maximum(y, 0.0).astype(o_ref.dtype)


def _max_reduce_kernel(x_ref, o_ref):
    o_ref[...] = jnp.max(x_ref[...], axis=0)


@functools.lru_cache(maxsize=None)
def _get_mm_fn(Mp, Kp, Np, tm, tn, relu, residual, out_dtype_name):
    out_dtype = jnp.dtype(out_dtype_name)
    in_specs = [
        pl.BlockSpec((tm, Kp), lambda i, j: (i, 0)),   # LHS: tiled over M
        pl.BlockSpec((Kp, tn), lambda i, j: (0, j)),   # RHS: tiled over N
        pl.BlockSpec((1, tn), lambda i, j: (0, j)),    # per-channel scale
        pl.BlockSpec((1, tn), lambda i, j: (0, j)),    # per-channel shift
    ]
    if residual:
        in_specs.append(pl.BlockSpec((tm, tn), lambda i, j: (i, j)))
        kernel = _mm_res_kernel
    else:
        kernel = functools.partial(_mm_kernel, relu=relu)
    f = pl.pallas_call(
        kernel,
        out_shape=jax.ShapeDtypeStruct((Mp, Np), out_dtype),
        grid=(Mp // tm, Np // tn),
        in_specs=in_specs,
        out_specs=pl.BlockSpec((tm, tn), lambda i, j: (i, j)),
        compiler_params=pltpu.CompilerParams(
            dimension_semantics=("parallel", "parallel"),
            vmem_limit_bytes=_VMEM_LIMIT,
        ),
    )
    return jax.jit(f)


@functools.lru_cache(maxsize=None)
def _get_max_reduce_fn(K, Mp, Cp, tm, tc, dtype_name):
    dt = jnp.dtype(dtype_name)
    f = pl.pallas_call(
        _max_reduce_kernel,
        out_shape=jax.ShapeDtypeStruct((Mp, Cp), dt),
        grid=(Mp // tm, Cp // tc),
        in_specs=[pl.BlockSpec((K, tm, tc), lambda i, j: (0, i, j))],
        out_specs=pl.BlockSpec((tm, tc), lambda i, j: (i, j)),
        compiler_params=pltpu.CompilerParams(
            dimension_semantics=("parallel", "parallel"),
            vmem_limit_bytes=_VMEM_LIMIT,
        ),
    )
    return jax.jit(f)


# ---------------------------------------------------------------------------
# Matmul wrapper (weights / scale / shift are pre-padded & pre-cast at init)
# ---------------------------------------------------------------------------
def matmul_scale_shift(a, w, scale, shift, *, relu, residual=None,
                       out_dtype=jnp.bfloat16, tm=256, tn=256):
    """y = act( (a @ w) * scale + shift [+ residual, then ReLU] ).

    a: (M, K) activations (cast to bf16 here); w: (Kp, Np) bf16 pre-padded;
    scale/shift: (1, Np) f32; residual: (M, Np) bf16 (implies ReLU epilogue)."""
    M, K = a.shape
    Kp, Np = w.shape
    Mp = _round_up(M, 16)                       # bf16 sublane packing -> 16-row alignment
    a_bf = a.astype(jnp.bfloat16)
    if Mp != M or Kp != K:
        a_bf = jnp.pad(a_bf, ((0, Mp - M), (0, Kp - K)))

    # Tile sizes: tn=256 fills the 2x256^2 MXU on v6e/v7x; tiny-M (FC head) -> single block.
    tn_eff = Np if Mp <= 16 else min(tn, Np)
    while Np % tn_eff:
        tn_eff //= 2
    tm_eff = _pick_tile_m(Mp, tm)

    args = [a_bf, w, scale, shift]
    if residual is not None:
        r = residual.astype(jnp.bfloat16)
        if r.shape[0] != Mp:
            r = jnp.pad(r, ((0, Mp - r.shape[0]), (0, 0)))
        assert r.shape == (Mp, Np), (r.shape, (Mp, Np))
        args.append(r)

    fn = _get_mm_fn(Mp, Kp, Np, tm_eff, tn_eff, bool(relu),
                    residual is not None, jnp.dtype(out_dtype).name)
    out = fn(*args)
    return out[:M] if Mp != M else out


# ---------------------------------------------------------------------------
# Plain-JAX glue: im2col, pooling window extraction
# ---------------------------------------------------------------------------
def im2col(x, kh, kw, stride, pad):
    """x: (N,H,W,C) -> (N*Ho*Wo, kh*kw*C) patches (pure pad/slice/reshape, bf16)."""
    N, H, W, C = x.shape
    xp = jnp.pad(x, ((0, 0), (pad, pad), (pad, pad), (0, 0)))
    Ho = (H + 2 * pad - kh) // stride + 1
    Wo = (W + 2 * pad - kw) // stride + 1
    cols = []
    for i in range(kh):
        for j in range(kw):
            cols.append(xp[:, i:i + stride * Ho:stride, j:j + stride * Wo:stride, :])
    patches = jnp.stack(cols, axis=3)                       # (N,Ho,Wo,kh*kw,C)
    return patches.reshape(N * Ho * Wo, kh * kw * C), Ho, Wo


def maxpool3x3_s2_p1(x):
    """PyTorch MaxPool2d(kernel=3, stride=2, padding=1) — tiled Pallas max-reduction."""
    N, H, W, C = x.shape
    k, stride, pad = 3, 2, 1
    Ho = (H + 2 * pad - k) // stride + 1
    Wo = (W + 2 * pad - k) // stride + 1
    xp = jnp.pad(x, ((0, 0), (pad, pad), (pad, pad), (0, 0)), constant_values=-1e30)
    taps = [xp[:, i:i + stride * Ho:stride, j:j + stride * Wo:stride, :]
            for i in range(k) for j in range(k)]
    stk = jnp.stack(taps, axis=0).reshape(k * k, N * Ho * Wo, C)
    M = N * Ho * Wo
    Mp = _round_up(M, 16)
    if Mp != M:
        stk = jnp.pad(stk, ((0, 0), (0, Mp - M), (0, 0)), constant_values=-1e30)
    tm = _pick_tile_m(Mp, 512)
    tc = min(256, C)
    while C % tc:
        tc //= 2
    out = _get_max_reduce_fn(k * k, Mp, C, tm, tc, stk.dtype.name)(stk)
    return out[:M].reshape(N, Ho, Wo, C)


# ---------------------------------------------------------------------------
# ResNet-50 building blocks
# ---------------------------------------------------------------------------
def conv_bn(x, p, kh, kw, stride, pad, relu, residual=None):
    """Conv (no bias) + folded eval-mode BN (+ fused residual/ReLU) via Pallas matmul."""
    N = x.shape[0]
    if kh == 1 and kw == 1 and pad == 0:
        if stride != 1:
            x = x[:, ::stride, ::stride, :]
        Ho, Wo = x.shape[1], x.shape[2]
        patches = x.reshape(N * Ho * Wo, x.shape[3])        # free reshape, no im2col copy
    else:
        patches, Ho, Wo = im2col(x, kh, kw, stride, pad)
    out = matmul_scale_shift(patches, p["w"], p["scale"], p["shift"],
                             relu=relu, residual=residual)
    return out.reshape(N, Ho, Wo, -1)


def bottleneck(x, p, stride):
    if "down" in p:
        identity = conv_bn(x, p["down"], 1, 1, stride, 0, relu=False)
    else:
        identity = x
    out = conv_bn(x, p["conv1"], 1, 1, 1, 0, relu=True)
    out = conv_bn(out, p["conv2"], 3, 3, stride, 1, relu=True)
    N, Ho, Wo, _ = out.shape
    res = identity.reshape(N * Ho * Wo, identity.shape[-1])
    # residual add + ReLU fused into the conv3 matmul epilogue (relu flag ignored there)
    out = conv_bn(out, p["conv3"], 1, 1, 1, 0, relu=False, residual=res)
    return out


def di_resnet50_forward(params, x_nchw, num_out=4):
    # input is NCHW (PyTorch convention); convert once to NHWC bf16 for the kernels.
    x = jnp.transpose(x_nchw, (0, 2, 3, 1)).astype(jnp.bfloat16)
    x = conv_bn(x, params["stem"], 7, 7, 2, 3, relu=True)
    x = maxpool3x3_s2_p1(x)
    for name, stride in (("layer1", 1), ("layer2", 2), ("layer3", 2), ("layer4", 2)):
        for i, bp in enumerate(params[name]):
            x = bottleneck(x, bp, stride if i == 0 else 1)
    N, H, W, C = x.shape
    feats = jnp.mean(x.reshape(N, H * W, C).astype(jnp.float32), axis=1)  # GAP (glue)
    # resnet.fc (Linear 2048->hidden) with the DIResNet ReLU fused into the epilogue.
    h = matmul_scale_shift(feats, params["fc1"]["w"],
                           params["fc1"]["scale"], params["fc1"]["shift"], relu=True)
    # TODO(synk): nn.Dropout(0.5) applied in eval mode (identity); training mask omitted.
    out = matmul_scale_shift(h, params["fc2"]["w"],
                             params["fc2"]["scale"], params["fc2"]["shift"],
                             relu=False, out_dtype=jnp.float32)
    return out[:, :num_out]


# ---------------------------------------------------------------------------
# Deterministic parameter initialization (shapes match torchvision resnet50),
# pre-padded to MXU-friendly shapes and pre-cast to bf16 ONCE here.
# ---------------------------------------------------------------------------
class KeyGen:
    def __init__(self, key):
        self._key = key

    def __call__(self):
        self._key, k = jax.random.split(self._key)
        return k


def make_conv_bn(kg, kh, kw, cin, cout):
    # Physical (padded) channel counts used by the activation pipeline.
    cin_phys = cin if cin <= 3 else _round_up(cin, 128)
    cout_p = _round_up(cout, 128)
    std = (2.0 / (kh * kw * cin)) ** 0.5
    w = std * jax.random.normal(kg(), (kh, kw, cin, cout), jnp.float32)
    gamma = 1.0 + 0.1 * jax.random.normal(kg(), (cout,), jnp.float32)
    beta = 0.1 * jax.random.normal(kg(), (cout,), jnp.float32)
    rmean = 0.1 * jax.random.normal(kg(), (cout,), jnp.float32)
    rvar = 1.0 + 0.1 * jax.random.uniform(kg(), (cout,), jnp.float32)
    eps = 1e-5
    scale = gamma / jnp.sqrt(rvar + eps)
    shift = beta - rmean * scale

    w_full = jnp.zeros((kh, kw, cin_phys, cout_p), jnp.float32)
    w_full = w_full.at[:, :, :cin, :cout].set(w)
    K = kh * kw * cin_phys
    Kp = _round_up(K, 128)
    w_p = jnp.zeros((Kp, cout_p), jnp.bfloat16)
    w_p = w_p.at[:K, :].set(w_full.reshape(K, cout_p).astype(jnp.bfloat16))
    s = jnp.zeros((1, cout_p), jnp.float32).at[0, :cout].set(scale)
    t = jnp.zeros((1, cout_p), jnp.float32).at[0, :cout].set(shift)
    return {"w": w_p, "scale": s, "shift": t}


def make_bottleneck(kg, cin, width, stride):
    p = {
        "conv1": make_conv_bn(kg, 1, 1, cin, width),
        "conv2": make_conv_bn(kg, 3, 3, width, width),
        "conv3": make_conv_bn(kg, 1, 1, width, width * 4),
    }
    if stride != 1 or cin != width * 4:
        p["down"] = make_conv_bn(kg, 1, 1, cin, width * 4)
    return p


def make_layer(kg, cin, width, nblocks, stride):
    blocks = [make_bottleneck(kg, cin, width, stride)]
    for _ in range(nblocks - 1):
        blocks.append(make_bottleneck(kg, width * 4, width, 1))
    return blocks


def make_linear(kg, cin, cout):
    bound = 1.0 / (cin ** 0.5)
    w = jax.random.uniform(kg(), (cin, cout), jnp.float32, -bound, bound)
    b = jax.random.uniform(kg(), (cout,), jnp.float32, -bound, bound)
    cin_p, cout_p = _round_up(cin, 128), _round_up(cout, 128)
    w_p = jnp.zeros((cin_p, cout_p), jnp.bfloat16).at[:cin, :cout].set(
        w.astype(jnp.bfloat16))
    s = jnp.zeros((1, cout_p), jnp.float32).at[0, :cout].set(1.0)
    t = jnp.zeros((1, cout_p), jnp.float32).at[0, :cout].set(b)
    return {"w": w_p, "scale": s, "shift": t}


def init_params(key, num_classes=2, num_biases=2, hidden_size=2048):
    kg = KeyGen(key)
    return {
        "stem": make_conv_bn(kg, 7, 7, 3, 64),
        "layer1": make_layer(kg, 64, 64, 3, 1),
        "layer2": make_layer(kg, 256, 128, 4, 2),
        "layer3": make_layer(kg, 512, 256, 6, 2),
        "layer4": make_layer(kg, 1024, 512, 3, 2),
        "fc1": make_linear(kg, 2048, hidden_size),                      # resnet.fc
        "fc2": make_linear(kg, hidden_size, num_classes * num_biases),  # self.fc
    }


# ---------------------------------------------------------------------------
if __name__ == "__main__":
    key = jax.random.PRNGKey(0)
    pkey, xkey = jax.random.split(key)
    num_classes, num_biases = 2, 2
    params = init_params(pkey, num_classes=num_classes, num_biases=num_biases,
                         hidden_size=2048)
    x = jax.random.normal(xkey, (2, 3, 16, 16), jnp.float32)   # NCHW, like PyTorch
    out = di_resnet50_forward(params, x, num_out=num_classes * num_biases)
    out = jax.block_until_ready(out)
    assert out.shape == (2, 4), out.shape
    assert bool(jnp.all(jnp.isfinite(out)))
    print("KERNEL_OK")
</pallas_src>

<mosaic_0001>
module attributes {stable_mosaic.version = 11 : i64} {
  func.func @_mm_kernel(%arg0: i32, %arg1: i32, %arg2: memref<128x256xbf16, #tpu.memory_space<vmem>>, %arg3: memref<256x128xbf16, #tpu.memory_space<vmem>>, %arg4: memref<1x128xf32, #tpu.memory_space<vmem>>, %arg5: memref<1x128xf32, #tpu.memory_space<vmem>>, %arg6: memref<128x128xbf16, #tpu.memory_space<vmem>>) attributes {dimension_semantics = [#tpu.dimension_semantics<parallel>, #tpu.dimension_semantics<parallel>], iteration_bounds = array<i64: 1, 1>, scalar_prefetch = 0 : i64, scratch_operands = 0 : i64, tpu.core_type = #tpu.core_type<tc>, window_params = [{transform_indices = @transform_0, window_bounds = array<i64: 128, 256>}, {transform_indices = @transform_1, window_bounds = array<i64: 256, 128>}, {transform_indices = @transform_2, window_bounds = array<i64: 1, 128>}, {transform_indices = @transform_3, window_bounds = array<i64: 1, 128>}, {transform_indices = @transform_4, window_bounds = array<i64: 128, 128>}]} {
    %c0 = arith.constant 0 : index
    %c0_0 = arith.constant 0 : index
    %0 = vector.load %arg2[%c0, %c0_0] : memref<128x256xbf16, #tpu.memory_space<vmem>>, vector<128x256xbf16>
    %c0_1 = arith.constant 0 : index
    %c0_2 = arith.constant 0 : index
    %1 = vector.load %arg3[%c0_1, %c0_2] : memref<256x128xbf16, #tpu.memory_space<vmem>>, vector<256x128xbf16>
    %cst = arith.constant dense<0.000000e+00> : vector<128x128xf32>
    %2 = tpu.matmul %0, %1, %cst {dimension_numbers = #tpu.dot_dimension_numbers<[1], [0], [0], [1], [0, 0, 1, 1], [], []>} : vector<128x256xbf16>, vector<256x128xbf16>, vector<128x128xf32> -> vector<128x128xf32>
    %c0_3 = arith.constant 0 : index
    %c0_4 = arith.constant 0 : index
    %3 = vector.load %arg4[%c0_3, %c0_4] : memref<1x128xf32, #tpu.memory_space<vmem>>, vector<1x128xf32>
    %4 = vector.broadcast %3 : vector<1x128xf32> to vector<128x128xf32>
    %5 = arith.mulf %2, %4 : vector<128x128xf32>
    %c0_5 = arith.constant 0 : index
    %c0_6 = arith.constant 0 : index
    %6 = vector.load %arg5[%c0_5, %c0_6] : memref<1x128xf32, #tpu.memory_space<vmem>>, vector<1x128xf32>
    %7 = vector.broadcast %6 : vector<1x128xf32> to vector<128x128xf32>
    %8 = arith.addf %5, %7 : vector<128x128xf32>
    %cst_7 = arith.constant 0.000000e+00 : f32
    %9 = vector.broadcast %cst_7 : f32 to vector<128x128xf32>
    %10 = arith.maximumf %8, %9 : vector<128x128xf32>
    %11 = arith.truncf %10 : vector<128x128xf32> to vector<128x128xbf16>
    %c0_8 = arith.constant 0 : index
    %c0_9 = arith.constant 0 : index
    %12 = vector.load %arg6[%c0_8, %c0_9] : memref<128x128xbf16, #tpu.memory_space<vmem>>, vector<128x128xbf16>
    tpu.vector_store %arg6[%c0_8, %c0_9], %11 {strides = array<i32>} : memref<128x128xbf16, #tpu.memory_space<vmem>>, vector<128x128xbf16>,
    return
  }
  func.func @transform_0(%arg0: i32, %arg1: i32) -> (i32, i32) {
    %c0_i32 = arith.constant 0 : i32
    %c0_i32_0 = arith.constant 0 : i32
    return %arg0, %c0_i32 : i32, i32
  }
  func.func @transform_1(%arg0: i32, %arg1: i32) -> (i32, i32) {
    %c0_i32 = arith.constant 0 : i32
    %c0_i32_0 = arith.constant 0 : i32
    return %c0_i32, %arg1 : i32, i32
  }
  func.func @transform_2(%arg0: i32, %arg1: i32) -> (i32, i32) {
    %c0_i32 = arith.constant 0 : i32
    %c0_i32_0 = arith.constant 0 : i32
    return %c0_i32, %arg1 : i32, i32
  }
  func.func @transform_3(%arg0: i32, %arg1: i32) -> (i32, i32) {
    %c0_i32 = arith.constant 0 : i32
    %c0_i32_0 = arith.constant 0 : i32
    return %c0_i32, %arg1 : i32, i32
  }
  func.func @transform_4(%arg0: i32, %arg1: i32) -> (i32, i32) {
    %c0_i32 = arith.constant 0 : i32
    return %arg0, %arg1 : i32, i32
  }
}

</mosaic_0001>

<bundles_post_ra>
// kernel: tpu_custom_call.1
= control target key start
LH: loop header
LB: loop body
LE: loop exit
PB: predicated region body
PF: predicated region fallthrough
CT: control target
= control target key end

     0   :  { %9 = vsyncpa [#allocation3], 0  ;;  %s956_s0 = inlined_call_operand.hbm [shape: bf16[128,256], index: 0, kind: input, shape index: {}]   ;;  %s957_s1 = inlined_call_operand.hbm [shape: bf16[256,128], index: 1, kind: input, shape index: {}]   ;;  %s958_s2 = inlined_call_operand.vmem [shape: f32[1,128], index: 2, kind: input, shape index: {}]   ;;  %s959_s3 = inlined_call_operand.vmem [shape: f32[1,128], index: 3, kind: input, shape index: {}]   ;;  %s960_s4 = inlined_call_operand.hbm [shape: bf16[128,128], index: 4, kind: output, shape index: {}]  }
   0x1   :  { %10 = vsyncpa [#allocation6], 0 }
   0x2   :  { %11 = vsyncpa [#allocation4], 0  ;;  %s840_s15 = smov [#allocation2]   ;;  %s768_s19 = scalar_lea.hbm %s956_s0, 2048 }
   0x3   :  { %s17_s16 = sshll.u32 %s840_s15, 4  ;;  %p769_p0 = scmp.ne.s32.totalorder %s956_s0, %s768_s19  ;;  %s18_s16 = int_to_ptr.vmem [resolvable:$true] %s17_s16 }
   0x4   :  { %p772_p1 = scmp.lt.u32.totalorder %s768_s19, %s956_s0 }
   0x6   :  { %p774_p2 = pnand %p772_p1, %p769_p0 }
   0x8   :  { %777 = shalt.err (!%p774_p2)
}
   0x9   :  { %s778_s24 = scalar_lea.vmem %s18_s16, 2048  ;;  %p783_p4 = scmp.lt.s32.totalorder %s18_s16, %s18_s16 }
   0xa   :  { %p779_p3 = scmp.ne.s32.totalorder %s18_s16, %s778_s24  ;;  %p784_p5 = scmp.lt.s32.totalorder %s778_s24, %s778_s24 }
   0xc   :  { %p785_p6 = por %p784_p5, %p783_p4 }
   0xe   :  { %p786_p7 = pnand %p785_p6, %p779_p3 }
  0x10   :  { %789 = shalt.err (!%p786_p7)
}
  0x11   :  { %s841_s25 = smov 128   ;;  %s842_s26 = smov 8  }
  0x12   :  { %23 = dma.hbm_to_vmem [thread:$0]  %s956_s0, 2048, %s18_s16, [#allocation3], %s841_s25, %s841_s25, %s842_s26  }
  0x13   :  { %s843_s29 = smov [#allocation5]   ;;  %s790_s7 = scalar_lea.hbm %s957_s1, 2048 }
  0x14   :  { %s29_s30 = sshll.u32 %s843_s29, 4  ;;  %p791_p8 = scmp.ne.s32.totalorder %s957_s1, %s790_s7  ;;  %s30_s30 = int_to_ptr.vmem [resolvable:$true] %s29_s30 }
  0x15   :  { %p794_p9 = scmp.lt.u32.totalorder %s790_s7, %s957_s1 }
  0x17   :  { %p796_p10 = pnand %p794_p9, %p791_p8 }
  0x19   :  { %799 = shalt.err (!%p796_p10)
}
  0x1a   :  { %s800_s12 = scalar_lea.vmem %s30_s30, 2048  ;;  %p805_p12 = scmp.lt.s32.totalorder %s30_s30, %s30_s30 }
  0x1b   :  { %p801_p11 = scmp.ne.s32.totalorder %s30_s30, %s800_s12  ;;  %p806_p13 = scmp.lt.s32.totalorder %s800_s12, %s800_s12 }
  0x1d   :  { %p807_p0 = por %p806_p13, %p805_p12 }
  0x1f   :  { %p808_p1 = pnand %p807_p0, %p801_p11 }
  0x21   :  { %811 = shalt.err (!%p808_p1)
}
  0x22   :  { %s844_s0 = smov 64   ;;  %s845_s13 = smov 4  }
  0x23   :  { %35 = dma.hbm_to_vmem [thread:$0]  %s957_s1, 2048, %s30_s30, [#allocation6], %s844_s0, %s844_s0, %s845_s13  }
  0x24   :  { %834 = dma.done.wait [#allocation3], 2048  }
  0x25   :  { %835 = vsyncadd [#allocation3], 4294965248 }
  0x26   :  { %836 = dma.done.wait [#allocation6], 2048  }
  0x27   :  { %837 = vsyncadd [#allocation6], 4294965248  ;;  %v728_v0 = vld [vmem:[#allocation5 + $0x40] sm:$0xff]   ;;  %v730_v2 = vld [vmem:[#allocation5 + $0x48] sm:$0xff]  }
  0x28   :  { %v729_v1 = vld [vmem:[#allocation5] sm:$0xff]   ;;  %641 = vmatprep.subr.bf16.mxu0 %v728_v0  ;;  %705 = vmatprep.subr.bf16.mxu1 %v728_v0  ;;  %v731_v3 = vld [vmem:[#allocation5 + $0x8] sm:$0xff]   ;;  %v732_v4 = vld [vmem:[#allocation5 + $0x50] sm:$0xff]  }
  0x29   :  { %642 = vmatpush3.bf16.msra.mxu0 %v729_v1  ;;  %713 = vmatpush3.bf16.msra.mxu1 %v729_v1  ;;  %v733_v5 = vld [vmem:[#allocation5 + $0x10] sm:$0xff]   ;;  %v734_v6 = vld [vmem:[#allocation5 + $0x58] sm:$0xff]   ;;  %v736_v8 = vld [vmem:[#allocation5 + $0x60] sm:$0xff]  }
  0x2a   :  { %643 = vmatprep.subr.bf16.mxu0 %v730_v2  ;;  %706 = vmatprep.subr.bf16.mxu1 %v730_v2  ;;  %v735_v7 = vld [vmem:[#allocation5 + $0x18] sm:$0xff]   ;;  %v737_v9 = vld [vmem:[#allocation5 + $0x20] sm:$0xff]   ;;  %v738_v10 = vld [vmem:[#allocation5 + $0x68] sm:$0xff]  }
  0x2b   :  { %v746_v11 = vld [vmem:[#allocation2 + $0x4] ss:$8 sps:$4 sm:$0xff]   ;;  %v740_v14 = vld [vmem:[#allocation5 + $0x70] sm:$0xff]   ;;  %v742_v16 = vld [vmem:[#allocation5 + $0x78] sm:$0xff]  }
  0x2c   :  { %v749_v12 = vld [vmem:[#allocation2 + $0x44] ss:$8 sps:$4 sm:$0xff]   ;;  %303 = vmatprep.mubr.bf16.mxu0 %v746_v11  ;;  %v741_v15 = vld [vmem:[#allocation5 + $0x30] sm:$0xff]   ;;  %v743_v17 = vld [vmem:[#allocation5 + $0x38] sm:$0xff]  }
  0x2d   :  { %644 = vmatpush3.bf16.msra.mxu0 %v731_v3  ;;  %714 = vmatpush3.bf16.msra.mxu1 %v731_v3  ;;  %v739_v13 = vld [vmem:[#allocation5 + $0x28] sm:$0xff]   ;;  %v750_v20 = vld [vmem:[#allocation2 + $0x14] ss:$8 sps:$4 sm:$0xff]   ;;  %v754_v22 = vld [vmem:[#allocation2 + $0x10] ss:$8 sps:$4 sm:$0xff]  }
  0x2e   :  { %645 = vmatprep.subr.bf16.mxu0 %v732_v4  ;;  %707 = vmatprep.subr.bf16.mxu1 %v732_v4  ;;  %v744_v18 = vld [vmem:[#allocation2] ss:$8 sps:$4 sm:$0xff]   ;;  %v752_v21 = vld [vmem:[#allocation2 + $0x54] ss:$8 sps:$4 sm:$0xff]   ;;  %v755_v23 = vld [vmem:[#allocation2 + $0x50] ss:$8 sps:$4 sm:$0xff]  }
  0x2f   :  { %335 = vmatprep.mubr.bf16.mxu1 %v749_v12  ;;  %v747_v19 = vld [vmem:[#allocation2 + $0x40] ss:$8 sps:$4 sm:$0xff]   ;;  %v756_v24 = vld [vmem:[#allocation2 + $0x24] ss:$8 sps:$4 sm:$0xff]   ;;  %v762_v28 = vld [vmem:[#allocation2 + $0x34] ss:$8 sps:$4 sm:$0xff]  }
  0x30   :  { %v758_v25 = vld [vmem:[#allocation2 + $0x64] ss:$8 sps:$4 sm:$0xff]   ;;  %v760_v26 = vld [vmem:[#allocation2 + $0x20] ss:$8 sps:$4 sm:$0xff]   ;;  %v764_v29 = vld [vmem:[#allocation2 + $0x74] ss:$8 sps:$4 sm:$0xff]  }
  0x31   :  { %646 = vmatpush3.bf16.msra.mxu0 %v733_v5  ;;  %715 = vmatpush3.bf16.msra.mxu1 %v733_v5  ;;  %v761_v27 = vld [vmem:[#allocation2 + $0x60] ss:$8 sps:$4 sm:$0xff]   ;;  %v766_v30 = vld [vmem:[#allocation2 + $0x30] ss:$8 sps:$4 sm:$0xff]  }
  0x32   :  { %647 = vmatprep.subr.bf16.mxu0 %v734_v6  ;;  %708 = vmatprep.subr.bf16.mxu1 %v734_v6  ;;  %v767_v31 = vld [vmem:[#allocation2 + $0x70] ss:$8 sps:$4 sm:$0xff]   ;;  %v902_v35 = vld [vmem:[%s958_s2] ss:$0 sm:$0xff]  ;;  %s846_s2 = smov [#allocation7]  }
  0x33   :  { %v907_v41 = vld [vmem:[%s959_s3] ss:$0 sm:$0xff]  ;;  %s515_s3 = sshll.u32 %s846_s2, 4  ;;  %s516_s3 = int_to_ptr.vmem [resolvable:$true] %s515_s3 }
  0x34   :  { %s812_s19 = scalar_lea.vmem %s516_s3, 1024  ;;  %p817_p3 = scmp.lt.s32.totalorder %s516_s3, %s516_s3 }
  0x35   :  { %648 = vmatpush3.bf16.msra.mxu0 %v735_v7  ;;  %716 = vmatpush3.bf16.msra.mxu1 %v735_v7  ;;  %p813_p2 = scmp.ne.s32.totalorder %s516_s3, %s812_s19  ;;  %p818_p4 = scmp.lt.s32.totalorder %s812_s19, %s812_s19 }
  0x36   :  { %649 = vmatprep.subr.bf16.mxu0 %v736_v8  ;;  %709 = vmatprep.subr.bf16.mxu1 %v736_v8 }
  0x37   :  { %p819_p5 = por %p818_p4, %p817_p3 }
  0x39   :  { %650 = vmatpush3.bf16.msra.mxu0 %v737_v9  ;;  %717 = vmatpush3.bf16.msra.mxu1 %v737_v9  ;;  %p820_p6 = pnand %p819_p5, %p813_p2 }
  0x3a   :  { %651 = vmatprep.subr.bf16.mxu0 %v738_v10  ;;  %710 = vmatprep.subr.bf16.mxu1 %v738_v10 }
  0x3d   :  { %652 = vmatpush3.bf16.msra.mxu0 %v739_v13  ;;  %718 = vmatpush3.bf16.msra.mxu1 %v739_v13 }
  0x3e   :  { %653 = vmatprep.subr.bf16.mxu0 %v740_v14  ;;  %711 = vmatprep.subr.bf16.mxu1 %v740_v14 }
  0x41   :  { %654 = vmatpush3.bf16.msra.mxu0 %v741_v15  ;;  %719 = vmatpush3.bf16.msra.mxu1 %v741_v15 }
  0x42   :  { %655 = vmatprep.subr.bf16.mxu0 %v742_v16  ;;  %712 = vmatprep.subr.bf16.mxu1 %v742_v16 }
  0x45   :  { %656 = vmatpush3.bf16.msra.mxu0 %v743_v17  ;;  %720 = vmatpush3.bf16.msra.mxu1 %v743_v17 }
  0x48   :  { %304 = vmatmul.mubr.bf16.vlgmr.msra.gmra.mrb[0].mxu0 %v744_v18  ;;  %336 = vmatmul.mubr.bf16.vlgmr.msra.gmra.mrb[0].mxu1 %v747_v19 }
  0x49   :  { %311 = vmatprep.mubr.bf16.mxu0 %v750_v20  ;;  %343 = vmatprep.mubr.bf16.mxu1 %v752_v21 }
  0x50   :  { %312 = vmatmul.mubr.bf16.gmra.mrb[4].mxu0 %v754_v22  ;;  %344 = vmatmul.mubr.bf16.gmra.mrb[4].mxu1 %v755_v23 }
  0x51   :  { %319 = vmatprep.mubr.bf16.mxu0 %v756_v24  ;;  %351 = vmatprep.mubr.bf16.mxu1 %v758_v25 }
  0x58   :  { %320 = vmatmul.mubr.bf16.gmra.mrb[8].mxu0 %v760_v26  ;;  %352 = vmatmul.mubr.bf16.gmra.mrb[8].mxu1 %v761_v27 }
  0x59   :  { %327 = vmatprep.mubr.bf16.mxu0 %v762_v28  ;;  %359 = vmatprep.mubr.bf16.mxu1 %v764_v29 }
  0x60   :  { %328 = vmatmul.mubr.bf16.gmra.mrb[12].mxu0 %v766_v30  ;;  %360 = vmatmul.mubr.bf16.gmra.mrb[12].mxu1 %v767_v31 }
 0x11b   :  { %v657_v32 = vpop.f32.mrb[0].mxu0  ;;  %v681_v33 = vpop.f32.mrb[0].mxu1 }
 0x11c   :  { %v658_v34 = vpop.f32.mrb[1].mxu0  ;;  %v682_v36 = vpop.f32.mrb[1].mxu1 }
 0x11d   :  { %v659_v37 = vadd.f32 %v658_v34, %v657_v32  ;;  %v683_v38 = vadd.f32 %v682_v36, %v681_v33  ;;  %v660_v39 = vpop.f32.mrb[2].mxu0  ;;  %v684_v40 = vpop.f32.mrb[2].mxu1 }
 0x11e   :  { %v661_v42 = vpop.f32.mrb[3].mxu0  ;;  %v685_v43 = vpop.f32.mrb[3].mxu1 }
 0x11f   :  { %v375_v44 = vmul.f32 %v659_v37, %v902_v35  ;;  %v383_v45 = vmul.f32 %v683_v38, %v902_v35  ;;  %v662_v46 = vadd.f32 %v661_v42, %v660_v39  ;;  %v686_v47 = vadd.f32 %v685_v43, %v684_v40 }
 0x121   :  { %v398_v48 = vadd.f32 %v907_v41, %v375_v44  ;;  %v406_v49 = vadd.f32 %v907_v41, %v383_v45  ;;  %v376_v50 = vmul.f32 %v662_v46, %v902_v35  ;;  %v384_v51 = vmul.f32 %v686_v47, %v902_v35 }
 0x123   :  { %v399_v52 = vadd.f32 %v907_v41, %v376_v50  ;;  %v407_v53 = vadd.f32 %v907_v41, %v384_v51  ;;  %v663_v54 = vpop.f32.mrb[4].mxu0  ;;  %v687_v55 = vpop.f32.mrb[4].mxu1  ;;  %v414_v56 = vmax.f32 %v398_v48, 0.0  ;;  %v422_v57 = vmax.f32 %v406_v49, 0.0 }
 0x124   :  { %v664_v58 = vpop.f32.mrb[5].mxu0  ;;  %v688_v59 = vpop.f32.mrb[5].mxu1 }
 0x125   :  { %v415_v60 = vmax.f32 %v399_v52, 0.0  ;;  %v423_v61 = vmax.f32 %v407_v53, 0.0  ;;  %v665_v62 = vadd.f32 %v664_v58, %v663_v54  ;;  %v689_v63 = vadd.f32 %v688_v59, %v687_v55  ;;  %v666_v0 = vpop.f32.mrb[6].mxu0  ;;  %v690_v1 = vpop.f32.mrb[6].mxu1 }
 0x126   :  { %v667_v2 = vpop.f32.mrb[7].mxu0  ;;  %v691_v3 = vpop.f32.mrb[7].mxu1 }
 0x127   :  { %v597_v4 = vpack.c.bf16 %v415_v60, %v414_v56  ;;  %v617_v5 = vpack.c.bf16 %v423_v61, %v422_v57  ;;  %v377_v6 = vmul.f32 %v665_v62, %v902_v35  ;;  %v385_v7 = vmul.f32 %v689_v63, %v902_v35 }
 0x128   :  { %v668_v8 = vadd.f32 %v667_v2, %v666_v0  ;;  %v692_v9 = vadd.f32 %v691_v3, %v690_v1 }
 0x129   :  { %598 = vst [vmem:[#allocation7] sm:$0xff] %v597_v4   ;;  %637 = vst [vmem:[#allocation7 + $0x20] sm:$0xff] %v617_v5   ;;  %v400_v10 = vadd.f32 %v907_v41, %v377_v6  ;;  %v408_v11 = vadd.f32 %v907_v41, %v385_v7 }
 0x12a   :  { %v378_v12 = vmul.f32 %v668_v8, %v902_v35  ;;  %v386_v13 = vmul.f32 %v692_v9, %v902_v35 }
 0x12b   :  { %v669_v14 = vpop.f32.mrb[8].mxu0  ;;  %v693_v15 = vpop.f32.mrb[8].mxu1  ;;  %v416_v24 = vmax.f32 %v400_v10, 0.0  ;;  %v424_v25 = vmax.f32 %v408_v11, 0.0 }
 0x12c   :  { %v401_v16 = vadd.f32 %v907_v41, %v378_v12  ;;  %v409_v17 = vadd.f32 %v907_v41, %v386_v13  ;;  %v670_v18 = vpop.f32.mrb[9].mxu0  ;;  %v694_v19 = vpop.f32.mrb[9].mxu1 }
 0x12d   :  { %v671_v20 = vadd.f32 %v670_v18, %v669_v14  ;;  %v695_v21 = vadd.f32 %v694_v19, %v693_v15  ;;  %v672_v22 = vpop.f32.mrb[10].mxu0  ;;  %v696_v23 = vpop.f32.mrb[10].mxu1 }
 0x12e   :  { %v417_v26 = vmax.f32 %v401_v16, 0.0  ;;  %v425_v27 = vmax.f32 %v409_v17, 0.0  ;;  %v673_v28 = vpop.f32.mrb[11].mxu0  ;;  %v697_v29 = vpop.f32.mrb[11].mxu1 }
 0x12f   :  { %v379_v30 = vmul.f32 %v671_v20, %v902_v35  ;;  %v387_v31 = vmul.f32 %v695_v21, %v902_v35  ;;  %v674_v32 = vadd.f32 %v673_v28, %v672_v22  ;;  %v698_v33 = vadd.f32 %v697_v29, %v696_v23 }
 0x130   :  { %v602_v34 = vpack.c.bf16 %v417_v26, %v416_v24  ;;  %v622_v36 = vpack.c.bf16 %v425_v27, %v424_v25 }
 0x131   :  { %v402_v37 = vadd.f32 %v907_v41, %v379_v30  ;;  %v410_v38 = vadd.f32 %v907_v41, %v387_v31  ;;  %v380_v39 = vmul.f32 %v674_v32, %v902_v35  ;;  %v388_v40 = vmul.f32 %v698_v33, %v902_v35 }
 0x132   :  { %634 = vst [vmem:[#allocation7 + $0x8] sm:$0xff] %v602_v34   ;;  %638 = vst [vmem:[#allocation7 + $0x28] sm:$0xff] %v622_v36  }
 0x133   :  { %v403_v42 = vadd.f32 %v907_v41, %v380_v39  ;;  %v411_v43 = vadd.f32 %v907_v41, %v388_v40  ;;  %v675_v44 = vpop.f32.mrb[12].mxu0  ;;  %v699_v45 = vpop.f32.mrb[12].mxu1  ;;  %v418_v46 = vmax.f32 %v402_v37, 0.0  ;;  %v426_v47 = vmax.f32 %v410_v38, 0.0 }
 0x134   :  { %v676_v48 = vpop.f32.mrb[13].mxu0  ;;  %v700_v49 = vpop.f32.mrb[13].mxu1 }
 0x135   :  { %v419_v50 = vmax.f32 %v403_v42, 0.0  ;;  %v427_v51 = vmax.f32 %v411_v43, 0.0  ;;  %v677_v52 = vadd.f32 %v676_v48, %v675_v44  ;;  %v701_v53 = vadd.f32 %v700_v49, %v699_v45  ;;  %v678_v54 = vpop.f32.mrb[14].mxu0  ;;  %v702_v55 = vpop.f32.mrb[14].mxu1 }
 0x136   :  { %v679_v56 = vpop.f32.mrb[15].mxu0  ;;  %v703_v57 = vpop.f32.mrb[15].mxu1 }
 0x137   :  { %v607_v58 = vpack.c.bf16 %v419_v50, %v418_v46  ;;  %v627_v59 = vpack.c.bf16 %v427_v51, %v426_v47  ;;  %v381_v60 = vmul.f32 %v677_v52, %v902_v35  ;;  %v389_v61 = vmul.f32 %v701_v53, %v902_v35 }
 0x138   :  { %v680_v62 = vadd.f32 %v679_v56, %v678_v54  ;;  %v704_v63 = vadd.f32 %v703_v57, %v702_v55 }
 0x139   :  { %635 = vst [vmem:[#allocation7 + $0x10] sm:$0xff] %v607_v58   ;;  %639 = vst [vmem:[#allocation7 + $0x30] sm:$0xff] %v627_v59   ;;  %v404_v0 = vadd.f32 %v907_v41, %v381_v60  ;;  %v412_v1 = vadd.f32 %v907_v41, %v389_v61 }
 0x13a   :  { %v382_v2 = vmul.f32 %v680_v62, %v902_v35  ;;  %v390_v3 = vmul.f32 %v704_v63, %v902_v35 }
 0x13b   :  { %v420_v6 = vmax.f32 %v404_v0, 0.0  ;;  %v428_v7 = vmax.f32 %v412_v1, 0.0 }
 0x13c   :  { %v405_v4 = vadd.f32 %v907_v41, %v382_v2  ;;  %v413_v5 = vadd.f32 %v907_v41, %v390_v3 }
 0x13e   :  { %v421_v8 = vmax.f32 %v405_v4, 0.0  ;;  %v429_v9 = vmax.f32 %v413_v5, 0.0 }
 0x140   :  { %v612_v10 = vpack.c.bf16 %v421_v8, %v420_v6  ;;  %v632_v11 = vpack.c.bf16 %v429_v9, %v428_v7 }
 0x142   :  { %636 = vst [vmem:[#allocation7 + $0x18] sm:$0xff] %v612_v10   ;;  %640 = vst [vmem:[#allocation7 + $0x38] sm:$0xff] %v632_v11  }
 0x143   :  { %823 = shalt.err (!%p820_p6)
}
 0x144   :  { %s824_s22 = scalar_lea.hbm %s960_s4, 1024 }
 0x145   :  { %p825_p7 = scmp.ne.s32.totalorder %s960_s4, %s824_s22  ;;  %p828_p8 = scmp.lt.u32.totalorder %s824_s22, %s960_s4 }
 0x147   :  { %p830_p9 = pnand %p828_p8, %p825_p7 }
 0x149   :  { %833 = shalt.err (!%p830_p9)
}
 0x14a   :  { %521 = dma.vmem_to_hbm [thread:$0]  %s516_s3, 1024, %s960_s4, [#allocation4], %s844_s0, %s844_s0, %s845_s13  }
 0x14b   :  { %838 = dma.done.wait [#allocation4], 1024  }
 0x14c   :  { %839 = vsyncadd [#allocation4], 4294966272 }
 0x14d   :  { %525 = vsyncpa [#allocation3], 1 }
 0x14e   :  { %526 = vsyncpa [#allocation6], 1 }
 0x14f   :  { %527 = vsyncpa [#allocation4], 1 }

</bundles_post_ra>
